<compile_context>
chip_gen: v7x
topology: tpu7x:2x2x1
jax: 0.10.0
libtpu: 0.0.40
codegen_flags: <defaults>
</compile_context>

<pallas_src>
import jax
import jax.numpy as jnp
from jax import lax
from jax.experimental import pallas as pl
from jax.experimental.pallas import tpu as pltpu

_LANES = 128
_SUBLANES = 8


def _make_kernel(distance: str, temperature: float):
    # Keep this a *Python* float so it folds in as a literal instead of being
    # captured as a traced f32[] constant.
    inv_temp = 1.0 / float(temperature)

    def kernel(x1_ref, x2_ref, red_ref, out_ref):
        # x2 is always (Bb, C, T).  x1 is (Bb, T, C) for l2/cosine (wrapper
        # transposes once in HBM) so the Gram einsum is the non-transposed
        # "btc,bcs->bts" form; x1 stays (Bb, C, T) for l1.
        t2 = x2_ref[...].astype(jnp.float32)
        Bb, C, T = t2.shape

        if distance == "l2":
            t1 = x1_ref[...].astype(jnp.float32)                     # (Bb,T,C)
            # f32 Gram: the n1 + n2 - 2g cancellation is too lossy in bf16.
            g = jnp.einsum("btc,bcs->bts", t1, t2,
                           preferred_element_type=jnp.float32)       # (Bb,T,T)
            n1 = jnp.sum(t1 * t1, axis=-1)                           # (Bb,T)
            n2 = jnp.sum(t2 * t2, axis=1)                            # (Bb,T)
            d2 = n1[:, :, None] + n2[:, None, :] - 2.0 * g
            dist = jnp.sqrt(jnp.maximum(d2, 0.0))
        elif distance == "cosine":
            t1 = x1_ref[...]                                         # (Bb,T,C)
            # bf16 MXU operands are numerically safe for cosine (no
            # cancellation); accumulate in f32.
            g = jnp.einsum("btc,bcs->bts",
                           t1.astype(jnp.bfloat16),
                           x2_ref[...].astype(jnp.bfloat16),
                           preferred_element_type=jnp.float32)       # (Bb,T,T)
            t1f = t1.astype(jnp.float32)
            n1 = jnp.maximum(jnp.sqrt(jnp.sum(t1f * t1f, axis=-1)), 1e-8)
            n2 = jnp.maximum(jnp.sqrt(jnp.sum(t2 * t2, axis=1)), 1e-8)
            dist = g / (n1[:, :, None] * n2[:, None, :])
        else:  # l1
            # Chunk the feature reduction; lax.fori_loop keeps the live set
            # bounded to one (Bb, ch, T, T) slab, loads stay inside the body.
            ch = min(C, 8)
            n_full = C // ch
            rem = C % ch

            def body(i, acc):
                c0 = pl.multiple_of(i * ch, ch)
                a = x1_ref[:, pl.ds(c0, ch), :].astype(jnp.float32)  # (Bb,ch,T)
                b = x2_ref[:, pl.ds(c0, ch), :].astype(jnp.float32)
                return acc + jnp.sum(
                    jnp.abs(a[:, :, :, None] - b[:, :, None, :]), axis=1)

            dist = lax.fori_loop(0, n_full, body,
                                 jnp.zeros((Bb, T, T), jnp.float32),
                                 unroll=(n_full <= 8))
            if rem:
                a = x1_ref[:, n_full * ch:, :].astype(jnp.float32)
                b = x2_ref[:, n_full * ch:, :].astype(jnp.float32)
                dist = dist + jnp.sum(
                    jnp.abs(a[:, :, :, None] - b[:, :, None, :]), axis=1)

        # PyTorch reference:
        #   e = exp(d/temp); p = e / (sum(e, 1) + 1e-7); out = sum(p * idx, 1)
        # Row-max subtraction with the eps rescaled by exp(-m) gives *exactly*
        # the same ratio (both num and den scale by exp(-m)) but never
        # overflows f32 for large distances / small temperatures.
        z = dist * inv_temp                                          # (Bb,T,T)
        m = jnp.max(z, axis=-1, keepdims=True)                       # (Bb,T,1)
        e = jnp.exp(z - m)                                           # (Bb,T,T)

        # den/num via a single MXU matmul against the constant (T, 128)
        # reduction matrix (col 0 = ones, col 1 = frame index, rest zero)
        # instead of two XLU lane reductions + a VPU multiply.
        nd = jnp.dot(e.reshape(Bb * T, T), red_ref[...],
                     preferred_element_type=jnp.float32)             # (Bb*T,128)
        den = nd[:, 0:1].reshape(Bb, T, 1)
        num = nd[:, 1:2].reshape(Bb, T, 1)
        expected = num / (den + 1e-7 * jnp.exp(-m))                  # (Bb,T,1)

        target = lax.broadcasted_iota(jnp.int32, (Bb, T, 1), 1).astype(jnp.float32)
        loss_blk = jnp.sum((expected - target) ** 2)

        # Lane-dense (1, 8, 128) output tile; the wrapper reads [i, 0, 0].
        out_ref[...] = jnp.full(out_ref.shape, loss_blk, dtype=out_ref.dtype)

    return kernel


def _apply_break_factor(t, break_factor):
    B, C, T = t.shape
    r = T % break_factor
    if r != 0:
        t = t[:, :, : T - r]
        T -= r
    t = t.reshape(B, C, break_factor, -1)
    t = jnp.transpose(t, (0, 2, 1, 3)).reshape(B * break_factor, C, -1)
    return t


def _vmem_capacity_bytes():
    """Generation-aware VMEM capacity (128 MiB v5e/v6e, 64 MiB per-core v7x)."""
    try:
        info = pltpu.get_tpu_info()
        for attr in ("vmem_capacity_bytes", "vmem_size_bytes", "vmem_bytes"):
            cap = getattr(info, attr, None)
            if cap:
                return min(int(cap), 128 * 1024 * 1024)
    except Exception:
        pass
    return 64 * 1024 * 1024   # conservative fallback (v7x per-core physical)


def _per_sample_vmem_bytes(C, T, distance):
    """Distance-dependent per-sample working-set estimate (f32 bytes)."""
    # Double-buffered inputs: 2 tensors x 2 buffers.
    input_bytes = 2 * 2 * C * T * 4
    if distance == "l1":
        ch = min(C, 8)
        # (ch, T, T) diff slab + |diff| + dist accumulator + z/e + slack.
        inter = (2 * ch + 4) * T * T * 4
    else:
        # g/dist, z, e plus broadcast temporaries for the norm terms.
        inter = 5 * T * T * 4
    inter += T * _LANES * 4 + 4 * T * 4   # nd rows + den/num/m/expected
    return input_bytes + inter


def _pick_block_size(Bp, C, T, distance, vmem_budget_bytes):
    """Largest divisor of Bp that fits the budget and keeps >= 2 grid steps."""
    per_sample = max(_per_sample_vmem_bytes(C, T, distance), 1)
    bb_cap = max(1, min(Bp, vmem_budget_bytes // per_sample))
    if Bp >= 2:
        # >= 2 steps on the "parallel" batch axis -> both TensorCores on v7x
        # (harmless on single-TC v5e/v6e).
        bb_cap = min(bb_cap, max(1, Bp // 2))
    divisors = [bb for bb in range(1, Bp + 1) if Bp % bb == 0 and bb <= bb_cap]
    even_steps = [bb for bb in divisors if (Bp // bb) % 2 == 0]
    pool = even_steps if even_steps else divisors
    return max(pool) if pool else 1


def contrastive_regression_loss(t1, t2, *, temperature, distance, break_factor):
    assert distance in ("l1", "l2", "cosine")
    if break_factor is not None:
        t1 = _apply_break_factor(t1, break_factor)
        t2 = _apply_break_factor(t2, break_factor)
    Bp, C, Tp = t1.shape

    vmem_cap = _vmem_capacity_bytes()
    vmem_budget = vmem_cap // 2           # block-sizing budget (estimate headroom)
    vmem_limit = (vmem_cap * 3) // 4      # scoped limit handed to Mosaic

    Bb = _pick_block_size(Bp, C, Tp, distance, vmem_budget)
    num_blocks = Bp // Bb

    # Constant reduction matrix: col 0 = ones, col 1 = frame index.  Constant
    # index_map -> DMA'd once, stays VMEM-resident across grid steps.
    red = jnp.zeros((Tp, _LANES), jnp.float32)
    red = red.at[:, 0].set(1.0)
    red = red.at[:, 1].set(jnp.arange(Tp, dtype=jnp.float32))

    if distance in ("l2", "cosine"):
        # (Bp, Tp, C): lhs contraction dim on the lane axis -> non-transposed
        # batched matmul inside the kernel (no in-kernel relayout).
        x1 = jnp.transpose(t1, (0, 2, 1))
        x1_spec = pl.BlockSpec((Bb, Tp, C), lambda i: (i, 0, 0))
    else:
        x1 = t1
        x1_spec = pl.BlockSpec((Bb, C, Tp), lambda i: (i, 0, 0))

    kernel = _make_kernel(distance, float(temperature))
    partial = pl.pallas_call(
        kernel,
        out_shape=jax.ShapeDtypeStruct((num_blocks, _SUBLANES, _LANES), jnp.float32),
        grid_spec=pltpu.PrefetchScalarGridSpec(
            num_scalar_prefetch=0,
            grid=(num_blocks,),
            in_specs=[
                x1_spec,
                pl.BlockSpec((Bb, C, Tp), lambda i: (i, 0, 0)),
                pl.BlockSpec((Tp, _LANES), lambda i: (0, 0)),
            ],
            out_specs=pl.BlockSpec((1, _SUBLANES, _LANES), lambda i: (i, 0, 0)),
        ),
        compiler_params=pltpu.CompilerParams(
            # Independent per-block partial sums -> parallel grid axis.
            dimension_semantics=("parallel",),
            vmem_limit_bytes=int(vmem_limit),
        ),
    )(x1, t2, red)
    total = jnp.sum(partial[:, 0, 0])
    return total / (Tp * Bp)


def reference_loss(t1, t2, *, temperature, distance, break_factor):
    """Pure-JAX mirror of the PyTorch forward, for verification."""
    if break_factor is not None:
        t1 = _apply_break_factor(t1, break_factor)
        t2 = _apply_break_factor(t2, break_factor)
    Bp, C, Tp = t1.shape
    idx = jnp.arange(Tp, dtype=jnp.float32)
    loss = jnp.float32(0.0)
    for i in range(Bp):
        a = t1[i].astype(jnp.float32)
        b = t2[i].astype(jnp.float32)
        if distance == "l2":
            diff = a.T[:, None, :] - b.T[None, :, :]
            d = jnp.sqrt(jnp.maximum(jnp.sum(diff * diff, axis=-1), 0.0))
        elif distance == "l1":
            d = jnp.sum(jnp.abs(a.T[:, None, :] - b.T[None, :, :]), axis=-1)
        else:
            num = a.T @ b
            na = jnp.maximum(jnp.linalg.norm(a, axis=0), 1e-8)
            nb = jnp.maximum(jnp.linalg.norm(b, axis=0), 1e-8)
            d = num / (na[:, None] * nb[None, :])
        e = jnp.exp(d / temperature)
        p = e / (jnp.sum(e, axis=1, keepdims=True) + 1e-7)
        out = jnp.sum(p * idx[None, :], axis=1)
        loss = loss + jnp.sum((out - idx) ** 2)
    return loss / (Tp * Bp)


if __name__ == "__main__":
    # Small, module-consistent shapes: (#batch, #features, #frames)
    B, C, T = 2, 8, 64
    temperature = 0.5
    break_factor = 4      # -> 8 samples of (C=8, T'=16) inside the kernel

    key = jax.random.PRNGKey(0)
    k1, k2 = jax.random.split(key)
    tensor1 = jax.random.normal(k1, (B, C, T), dtype=jnp.float32)
    tensor2 = jax.random.normal(k2, (B, C, T), dtype=jnp.float32)

    # Cosine uses bf16 MXU operands (intentional perf change) -> looser check.
    tols = {"l2": (1e-3, 1e-3), "l1": (1e-3, 1e-3), "cosine": (1e-2, 1e-2)}
    for distance in ("l2", "l1", "cosine"):
        loss = contrastive_regression_loss(
            tensor1, tensor2,
            temperature=temperature, distance=distance, break_factor=break_factor)
        loss = jax.block_until_ready(loss)
        ref = jax.block_until_ready(reference_loss(
            tensor1, tensor2,
            temperature=temperature, distance=distance, break_factor=break_factor))
        rtol, atol = tols[distance]
        assert jnp.isfinite(loss), f"{distance}: kernel produced non-finite loss"
        assert jnp.allclose(loss, ref, rtol=rtol, atol=atol), (distance, loss, ref)
    print("KERNEL_OK")
</pallas_src>

<mosaic_0001>
module attributes {stable_mosaic.version = 11 : i64} {
  func.func @kernel(%arg0: i32, %arg1: memref<4x16x8xf32, #tpu.memory_space<vmem>>, %arg2: memref<4x8x16xf32, #tpu.memory_space<vmem>>, %arg3: memref<16x128xf32, #tpu.memory_space<vmem>>, %arg4: memref<1x8x128xf32, #tpu.memory_space<vmem>>) attributes {dimension_semantics = [#tpu.dimension_semantics<parallel>], iteration_bounds = array<i64: 2>, scalar_prefetch = 0 : i64, scratch_operands = 0 : i64, tpu.core_type = #tpu.core_type<tc>, window_params = [{transform_indices = @transform_0, window_bounds = array<i64: 4, 16, 8>}, {transform_indices = @transform_1, window_bounds = array<i64: 4, 8, 16>}, {pipeline_mode = #tpu.pipeline_mode<synchronous>, transform_indices = @transform_2, window_bounds = array<i64: 16, 128>}, {transform_indices = @transform_3, window_bounds = array<i64: 1, 8, 128>}]} {
    %c0 = arith.constant 0 : index
    %c0_0 = arith.constant 0 : index
    %c0_1 = arith.constant 0 : index
    %0 = vector.load %arg2[%c0, %c0_0, %c0_1] : memref<4x8x16xf32, #tpu.memory_space<vmem>>, vector<4x8x16xf32>
    %c0_2 = arith.constant 0 : index
    %c0_3 = arith.constant 0 : index
    %c0_4 = arith.constant 0 : index
    %1 = vector.load %arg1[%c0_2, %c0_3, %c0_4] : memref<4x16x8xf32, #tpu.memory_space<vmem>>, vector<4x16x8xf32>
    "tpu.trace_start"() <{level = 10 : i32, message = "btc,bcs->bts"}> : () -> ()
    %cst = arith.constant dense<0.000000e+00> : vector<4x16x16xf32>
    %2 = tpu.matmul %1, %0, %cst {dimension_numbers = #tpu.dot_dimension_numbers<[2], [1], [1], [2], [0, 0, 0, 1, 1, 2], [0], [0]>} : vector<4x16x8xf32>, vector<4x8x16xf32>, vector<4x16x16xf32> -> vector<4x16x16xf32>
    "tpu.trace_stop"() : () -> ()
    %3 = arith.mulf %1, %1 : vector<4x16x8xf32>
    %cst_5 = arith.constant dense<0.000000e+00> : vector<4x16xf32>
    %4 = vector.multi_reduction <add>, %3, %cst_5 [2] : vector<4x16x8xf32> to vector<4x16xf32>
    %5 = arith.mulf %0, %0 : vector<4x8x16xf32>
    %cst_6 = arith.constant dense<0.000000e+00> : vector<4x16xf32>
    %6 = vector.multi_reduction <add>, %5, %cst_6 [1] : vector<4x8x16xf32> to vector<4x16xf32>
    %7 = vector.shape_cast %4 : vector<4x16xf32> to vector<4x16x1xf32>
    %8 = vector.shape_cast %6 : vector<4x16xf32> to vector<4x1x16xf32>
    %9 = vector.broadcast %7 : vector<4x16x1xf32> to vector<4x16x16xf32>
    %10 = vector.broadcast %8 : vector<4x1x16xf32> to vector<4x16x16xf32>
    %11 = arith.addf %9, %10 : vector<4x16x16xf32>
    %cst_7 = arith.constant 2.000000e+00 : f32
    %12 = vector.broadcast %cst_7 : f32 to vector<4x16x16xf32>
    %13 = arith.mulf %12, %2 : vector<4x16x16xf32>
    %14 = arith.subf %11, %13 : vector<4x16x16xf32>
    %cst_8 = arith.constant 0.000000e+00 : f32
    %15 = vector.broadcast %cst_8 : f32 to vector<4x16x16xf32>
    %16 = arith.maximumf %14, %15 : vector<4x16x16xf32>
    %17 = math.sqrt %16 : vector<4x16x16xf32>
    %cst_9 = arith.constant 2.000000e+00 : f32
    %18 = vector.broadcast %cst_9 : f32 to vector<4x16x16xf32>
    %19 = arith.mulf %17, %18 : vector<4x16x16xf32>
    %cst_10 = arith.constant dense<0xFF800000> : vector<4x16xf32>
    %20 = vector.multi_reduction <maximumf>, %19, %cst_10 [2] : vector<4x16x16xf32> to vector<4x16xf32>
    %21 = vector.shape_cast %20 : vector<4x16xf32> to vector<4x16x1xf32>
    %22 = vector.broadcast %21 : vector<4x16x1xf32> to vector<4x16x16xf32>
    %23 = arith.subf %19, %22 : vector<4x16x16xf32>
    %24 = math.exp %23 : vector<4x16x16xf32>
    %25 = vector.shape_cast %24 : vector<4x16x16xf32> to vector<64x16xf32>
    %c0_11 = arith.constant 0 : index
    %c0_12 = arith.constant 0 : index
    %26 = vector.load %arg3[%c0_11, %c0_12] : memref<16x128xf32, #tpu.memory_space<vmem>>, vector<16x128xf32>
    %cst_13 = arith.constant dense<0.000000e+00> : vector<64x128xf32>
    %27 = tpu.matmul %25, %26, %cst_13 {dimension_numbers = #tpu.dot_dimension_numbers<[1], [0], [0], [1], [0, 0, 1, 1], [], []>} : vector<64x16xf32>, vector<16x128xf32>, vector<64x128xf32> -> vector<64x128xf32>
    %28 = vector.extract_strided_slice %27 {offsets = [0, 0], sizes = [64, 1], strides = [1, 1]} : vector<64x128xf32> to vector<64x1xf32>
    %29 = vector.shape_cast %28 : vector<64x1xf32> to vector<4x16x1xf32>
    %30 = vector.extract_strided_slice %27 {offsets = [0, 1], sizes = [64, 1], strides = [1, 1]} : vector<64x128xf32> to vector<64x1xf32>
    %31 = vector.shape_cast %30 : vector<64x1xf32> to vector<4x16x1xf32>
    %cst_14 = arith.constant 0.000000e+00 : f32
    %32 = vector.broadcast %cst_14 : f32 to vector<4x16x1xf32>
    %33 = arith.subf %32, %21 : vector<4x16x1xf32>
    %34 = math.exp %33 : vector<4x16x1xf32>
    %cst_15 = arith.constant 1.000000e-07 : f32
    %35 = vector.broadcast %cst_15 : f32 to vector<4x16x1xf32>
    %36 = arith.mulf %35, %34 : vector<4x16x1xf32>
    %37 = arith.addf %29, %36 : vector<4x16x1xf32>
    %38 = arith.divf %31, %37 : vector<4x16x1xf32>
    %39 = tpu.iota {dimensions = array<i32: 1>} : vector<4x16x1xi32>
    %40 = arith.sitofp %39 : vector<4x16x1xi32> to vector<4x16x1xf32>
    %41 = arith.subf %38, %40 : vector<4x16x1xf32>
    %42 = arith.mulf %41, %41 : vector<4x16x1xf32>
    %43 = vector.shape_cast %42 : vector<4x16x1xf32> to vector<1x4x16x1xf32>
    %cst_16 = arith.constant dense<0.000000e+00> : vector<1xf32>
    %44 = vector.multi_reduction <add>, %43, %cst_16 [1, 2, 3] : vector<1x4x16x1xf32> to vector<1xf32>
    %45 = vector.shape_cast %44 : vector<1xf32> to vector<1x1x1x1xf32>
    %46 = vector.extract %45[0, 0, 0, 0] : f32 from vector<1x1x1x1xf32>
    %47 = vector.broadcast %46 : f32 to vector<1x8x128xf32>
    %c0_17 = arith.constant 0 : index
    %c0_18 = arith.constant 0 : index
    %c0_19 = arith.constant 0 : index
    %48 = vector.load %arg4[%c0_17, %c0_18, %c0_19] : memref<1x8x128xf32, #tpu.memory_space<vmem>>, vector<1x8x128xf32>
    tpu.vector_store %arg4[%c0_17, %c0_18, %c0_19], %47 {strides = array<i32>} : memref<1x8x128xf32, #tpu.memory_space<vmem>>, vector<1x8x128xf32>,
    return
  }
  func.func @transform_0(%arg0: i32) -> (i32, i32, i32) {
    %c0_i32 = arith.constant 0 : i32
    %c0_i32_0 = arith.constant 0 : i32
    %c0_i32_1 = arith.constant 0 : i32
    return %arg0, %c0_i32, %c0_i32_0 : i32, i32, i32
  }
  func.func @transform_1(%arg0: i32) -> (i32, i32, i32) {
    %c0_i32 = arith.constant 0 : i32
    %c0_i32_0 = arith.constant 0 : i32
    %c0_i32_1 = arith.constant 0 : i32
    return %arg0, %c0_i32, %c0_i32_0 : i32, i32, i32
  }
  func.func @transform_2(%arg0: i32) -> (i32, i32) {
    %c0_i32 = arith.constant 0 : i32
    %c0_i32_0 = arith.constant 0 : i32
    %c0_i32_1 = arith.constant 0 : i32
    return %c0_i32, %c0_i32_0 : i32, i32
  }
  func.func @transform_3(%arg0: i32) -> (i32, i32, i32) {
    %c0_i32 = arith.constant 0 : i32
    %c0_i32_0 = arith.constant 0 : i32
    %c0_i32_1 = arith.constant 0 : i32
    return %arg0, %c0_i32, %c0_i32_0 : i32, i32, i32
  }
}

</mosaic_0001>

<bundles_post_ra>
// kernel: tpu_custom_call.1
= control target key start
LH: loop header
LB: loop body
LE: loop exit
PB: predicated region body
PF: predicated region fallthrough
CT: control target
= control target key end

     0   :  { %8 = vsyncpa [#allocation3], 0  ;;  %s1645_s0 = inlined_call_operand.vmem [shape: f32[8,16,8], index: 0, kind: input, shape index: {}]   ;;  %s1646_s1 = inlined_call_operand.vmem [shape: f32[8,8,16], index: 1, kind: input, shape index: {}]   ;;  %s1647_s2 = inlined_call_operand.vmem [shape: f32[16,128], index: 2, kind: input, shape index: {}]   ;;  %s1648_s3 = inlined_call_operand.hbm [shape: f32[2,8,128], index: 3, kind: output, shape index: {}]  }
   0x1   :  { %10 = vsyncpa [#allocation3 + $0x1], 0  ;;  %s1415_s12 = smov 0   ;;  %s1417_s13 = smov 0  }
   0x2   :  { %s1419_s14 = smov 0   ;;  %s1421_s15 = smov 0  }
   0x3 LB: > { %s1436_s16 = sadd.s32 4294967295, %s1390_s15   ;;  %s1126_s17 = sadd.s32 4294967294, %s1390_s15   ;;  %s1390_s15 = sphi %s1421_s15, %s1654_s15   ;;  %s1386_s14 = sphi %s1419_s14, %s1653_s14   ;;  %s1382_s13 = sphi %s1417_s13, %s1652_s13   ;;  %s1378_s12 = sphi %s1415_s12, %s1651_s12  }
   0x4   : > { %s1440_s18 = sadd.s32 1, %s1390_s15   ;;  %s96_s19 = sadd.s32 1, %s1386_s14 }
   0x5   : > { %s93_s20 = ssub.s32 %s1390_s15, %s1440_s18  ;;  %p106_p0 = scmp.ne.s32.totalorder %s1386_s14, %s1382_s13 }
   0x6   : > { %p94_p1 = scmp.eq.s32.totalorder %s93_s20, 0  ;;  %p107_p2 = scmp.eq.s32.totalorder %s1436_s16, 1 }
   0x7   : > { %p112_p3 = scmp.ne.s32.totalorder %s1382_s13, %s1378_s12  ;;  %p113_p4 = scmp.eq.s32.totalorder %s1126_s17, 1 }
   0x8   : > { %s1451_s21 = scalar_select %p94_p1, %s1386_s14, %s96_s19  }
   0x9   : > { %p1453_p5 = por %p107_p2, %p106_p0  ;;  %p1457_p6 = por %p113_p4, %p112_p3 }
   0xa   : > { %p1129_p7 = scmp.ge.s32.totalorder %s1390_s15, 1  ;;  %p153_p8 = scmp.lt.s32.totalorder %s1390_s15, 3 }
   0xc   : > { %p154_p9 = pnand %p1129_p7, %p153_p8 }
   0xd   : > { %s1131_s24 = sshll.u32 (!%p154_p9), %s1436_s16, 2  ;;  %vm208_vm0 = vcmask (!%p154_p9), 64512   ;;  %vm569_vm1 = vcmask (!%p154_p9), 130048   ;;  %s1392_s10 = smov (!%p154_p9), 1  }
   0xe   : > { %157 = sbr.rel (%p154_p9) target bundleno = 1123 (0x463), region = 32  ;;  %p184_p10 = scmp.lt.s32.totalorder (!%p154_p9), %s1131_s24, 7 }
   0xf   : > { %s1393_s11 = smov (!%p154_p9), 127   ;;  %s180_s17 = sand.u32 (!%p154_p9), 1, %s1382_s13  }
  0x10   : > { %s1130_s19 = sshll.u32 (!%p154_p9), %s180_s17, 3  ;;  %s1042_s30 = scalar_lea.sflag (!%p154_p9), [#allocation3], %s180_s17 }
  0x11   : > { %s182_s20 = scalar_lea.vmem (!%p154_p9), [#allocation2], %s1130_s19 }
  0x15   : > { %s1656_s24 = smov (!%p184_p10, %s1131_s24), 7 }
  0x16   : > { %s1156_s25 = sshll.u32 %s1656_s24, 4  ;;  %s1135_s26 = sshll.u32 %s1656_s24, 3 }
  0x17   : > { %s188_s29 = scalar_lea.vmem %s1645_s0, %s1156_s25  ;;  %s194_s5 = scalar_lea.vmem %s1646_s1, %s1135_s26 }
  0x18   : > { %v196_v0 = vld [vmem:[%s194_s5] sm:$0xff]  ;;  %v197_v1 = vld [vmem:[%s194_s5 + $0x8] sm:$0xff]  ;;  %v202_v3 = vld [vmem:[%s188_s29 + $0x10] sm:$0xff]  ;;  %s1055_s24 = sshll.u32 %s182_s20, 4  ;;  %s1153_s25 = sshll.u32 %s1436_s16, 7  ;;  %s1600_s24 = int_to_ptr.vmem [resolvable:$true] %s1055_s24 }
  0x19   : > { %v200_v2 = vld [vmem:[%s188_s29] sm:$0xff]  ;;  %1179 = vmatprep.subr.mxu0 %v196_v0  ;;  %1184 = vmatprep.subr.mxu1 %v197_v1  ;;  %v201_v4 = vld [vmem:[%s188_s29 + $0x8] sm:$0xff]  ;;  %v203_v5 = vld [vmem:[%s188_s29 + $0x18] sm:$0xff]  ;;  %v535_v7 = vmul.f32 %v202_v3, %v202_v3  ;;  %v566_v28 = vmul.f32 %v197_v1, %v197_v1  ;;  %v565_v29 = vmul.f32 %v196_v0, %v196_v0  ;;  %s1328_s4 = scalar_lea.vmem %s1600_s24, 128  ;;  %s1394_s16 = smov [#allocation2]  }
  0x1a   : > { %1180 = vmatpush3.msra.mxu0 %v196_v0  ;;  %1181 = vmatprep.mubr.msk.f32.mxu0 %vm208_vm0, %v200_v2  ;;  %v533_v6 = vmul.f32 %v200_v2, %v200_v2  ;;  %v198_v8 = vld [vmem:[%s194_s5 + $0x10] sm:$0xff]  ;;  %v199_v9 = vld [vmem:[%s194_s5 + $0x18] sm:$0xff]  ;;  %v204_v10 = vld [vmem:[%s188_s29 + $0x20] sm:$0xff]  ;;  %v536_v16 = vmul.f32 %v203_v5, %v203_v5  ;;  %v534_v17 = vmul.f32 %v201_v4, %v201_v4  ;;  %p1329_p11 = scmp.ne.s32.totalorder %s1600_s24, %s1328_s4  ;;  %s1332_s5 = sshll.u32 %s1394_s16, 4  ;;  %s1333_s5 = int_to_ptr.vmem [resolvable:$false] %s1332_s5 }
  0x1b   : > { %1185 = vmatpush3.msra.mxu1 %v197_v1  ;;  %1186 = vmatprep.mubr.msk.f32.mxu1 %vm208_vm0, %v202_v3  ;;  %v206_v11 = vld [vmem:[%s188_s29 + $0x30] sm:$0xff]  ;;  %v205_v12 = vld [vmem:[%s188_s29 + $0x28] sm:$0xff]  ;;  %v207_v13 = vld [vmem:[%s188_s29 + $0x38] sm:$0xff]  ;;  %v547_v14 = vsel %vm208_vm0, %v535_v7, 0.0  ;;  %v537_v21 = vmul.f32 %v204_v10, %v204_v10  ;;  %v577_v30 = vsel %vm569_vm1, %v566_v28, 0.0  ;;  %v567_v31 = vmul.f32 %v198_v8, %v198_v8  ;;  %s1605_s29 = scalar_lea.hbm %s1648_s3, %s1153_s25  ;;  %s1334_s6 = scalar_lea.vmem %s1333_s5, 256 }
  0x1c   : > { %1182 = vmatmul.mubr.msk.f32.vlgmr.msra.gmra.mrb[0].mxu0 %vm208_vm0, %v201_v4  ;;  %1187 = vmatmul.mubr.msk.f32.vlgmr.msra.gmra.mrb[0].mxu1 %vm208_vm0, %v203_v5  ;;  %v541_v15 = vsel %vm208_vm0, %v533_v6, 0.0  ;;  %v550_v18 = vsel %vm208_vm0, %v536_v16, 0.0  ;;  %v544_v19 = vsel %vm208_vm0, %v534_v17, 0.0  ;;  %v538_v20 = vmul.f32 %v205_v12, %v205_v12  ;;  %p1330_p12 = pnand %p1329_p11, %p1453_p5  ;;  %p1335_p0 = scmp.lt.s32.totalorder %s1600_s24, %s1333_s5 }
  0x1d   : > { %1189 = vmatprep.subr.mxu0 %v198_v8  ;;  %1194 = vmatprep.subr.mxu1 %v199_v9  ;;  %v553_v23 = vsel %vm208_vm0, %v537_v21, 0.0  ;;  %v540_v24 = vmul.f32 %v207_v13, %v207_v13  ;;  %v539_v25 = vmul.f32 %v206_v11, %v206_v11  ;;  %v568_v32 = vmul.f32 %v199_v9, %v199_v9  ;;  %p1336_p1 = scmp.lt.s32.totalorder %s1334_s6, %s1328_s4 }
  0x1e   : > { %1190 = vmatpush3.msra.mxu0 %v198_v8  ;;  %1191 = vmatprep.mubr.msk.f32.mxu0 %vm208_vm0, %v204_v10  ;;  %v556_v22 = vsel %vm208_vm0, %v538_v20, 0.0  ;;  %v570_v33 = vsel %vm569_vm1, %v565_v29, 0.0  ;;  %v578_v34 = vrot.slane %v577_v30, 4  ;;  %v584_v35 = vsel %vm569_vm1, %v567_v31, 0.0  ;;  %p1331_p13 = pneg %p1330_p12 }
  0x1f   : > { %1195 = vmatpush3.msra.mxu1 %v199_v9  ;;  %1196 = vmatprep.mubr.msk.f32.mxu1 %vm208_vm0, %v206_v11  ;;  %v562_v26 = vsel %vm208_vm0, %v540_v24, 0.0  ;;  %v559_v27 = vsel %vm208_vm0, %v539_v25, 0.0  ;;  %v591_v36 = vsel %vm569_vm1, %v568_v32, 0.0  ;;  %v571_v37 = vrot.slane %v570_v33, 4  ;;  %p1337_p2 = por %p1336_p1, %p1335_p0 }
  0x20   : > { %1192 = vmatmul.mubr.msk.f32.vlgmr.msra.gmra.mrb[2].mxu0 %vm208_vm0, %v205_v12  ;;  %1197 = vmatmul.mubr.msk.f32.vlgmr.msra.gmra.mrb[2].mxu1 %vm208_vm0, %v207_v13  ;;  %v585_v38 = vrot.slane %v584_v35, 4  ;;  %v592_v39 = vrot.slane %v591_v36, 4  ;;  %v579_v40 = vadd.f32 %v578_v34, %v577_v30 }
  0x21   : > { %548 = vadd.xlane.f32.xlu1 %v547_v14  ;;  %542 = vadd.xlane.f32.xlu0 %v541_v15  ;;  %v572_v42 = vadd.f32 %v571_v37, %v570_v33  ;;  %p1338_p3 = pnand %p1337_p2, %p1331_p13 }
  0x22   : > { %v580_v44 = vrot.slane %v579_v40, 2  ;;  %v586_v45 = vadd.f32 %v585_v38, %v584_v35  ;;  %v593_v46 = vadd.f32 %v592_v39, %v591_v36 }
  0x23   : > { %v573_v47 = vrot.slane %v572_v42, 2 }
  0x24   : > { %v581_v48 = vadd.f32 %v580_v44, %v579_v40  ;;  %v587_v51 = vrot.slane %v586_v45, 2  ;;  %v594_v52 = vrot.slane %v593_v46, 2 }
  0x25   : > { %551 = vadd.xlane.f32.xlu1 %v550_v18  ;;  %545 = vadd.xlane.f32.xlu0 %v544_v19  ;;  %v574_v53 = vadd.f32 %v573_v47, %v572_v42 }
  0x26   : > { %v582_v54 = vrot.slane %v581_v48, 1  ;;  %v588_v55 = vadd.f32 %v587_v51, %v586_v45  ;;  %v595_v56 = vadd.f32 %v594_v52, %v593_v46 }
  0x27   : > { %v575_v57 = vrot.slane %v574_v53, 1 }
  0x28   : > { %v583_v60 = vadd.f32 %v582_v54, %v581_v48  ;;  %v589_v61 = vrot.slane %v588_v55, 1  ;;  %v596_v62 = vrot.slane %v595_v56, 1 }
  0x29   : > { %557 = vadd.xlane.f32.xlu1 %v556_v22  ;;  %554 = vadd.xlane.f32.xlu0 %v553_v23  ;;  %v576_v63 = vadd.f32 %v575_v57, %v574_v53 }
  0x2a   : > { %v590_v2 = vadd.f32 %v589_v61, %v588_v55  ;;  %v597_v3 = vadd.f32 %v596_v62, %v595_v56 }
  0x2d   : > { %563 = vadd.xlane.f32.xlu1 %v562_v26  ;;  %560 = vadd.xlane.f32.xlu0 %v559_v27 }
  0xae   : > { %v549_v41 = vpop.xlane.xlu1 %548  ;;  %v543_v43 = vpop.xlane.xlu0 %542 }
  0xaf   : > { %v600_v6 = vadd.f32 %v583_v60, %v549_v41  ;;  %v598_v13 = vadd.f32 %v576_v63, %v543_v43 }
  0xb2   : > { %v552_v49 = vpop.xlane.xlu1 %551  ;;  %v546_v50 = vpop.xlane.xlu0 %545 }
  0xb3   : > { %v601_v0 = vadd.f32 %v583_v60, %v552_v49  ;;  %v599_v1 = vadd.f32 %v576_v63, %v546_v50 }
  0xb6   : > { %v558_v58 = vpop.xlane.xlu1 %557  ;;  %v555_v59 = vpop.xlane.xlu0 %554 }
  0xb7   : > { %v603_v16 = vadd.f32 %v590_v2, %v558_v58  ;;  %v602_v21 = vadd.f32 %v590_v2, %v555_v59 }
  0xba   : > { %v564_v4 = vpop.xlane.xlu1 %563  ;;  %v561_v5 = vpop.xlane.xlu0 %560 }
  0xbb   : > { %v605_v19 = vadd.f32 %v597_v3, %v564_v4  ;;  %v604_v25 = vadd.f32 %v597_v3, %v561_v5 }
  0xef   : > { %v1183_v7 = vpop.f32.mrb[0].mxu0  ;;  %v1188_v8 = vpop.f32.mrb[0].mxu1 }
  0xf0   : > { %v607_v9 = vmul.f32 2.0, %v1183_v7  ;;  %v609_v10 = vmul.f32 2.0, %v1188_v8  ;;  %v362_v11 = vpop.f32.mrb[1].mxu1  ;;  %v281_v12 = vpop.f32.mrb[1].mxu0 }
  0xf1   : > { %v608_v14 = vmul.f32 2.0, %v362_v11  ;;  %v606_v15 = vmul.f32 2.0, %v281_v12 }
  0xf2   : > { %v615_v17 = vsub.f32 %v599_v1, %v607_v9  ;;  %v617_v18 = vsub.f32 %v601_v0, %v609_v10 }
  0xf3   : > { %v616_v20 = vsub.f32 %v600_v6, %v608_v14  ;;  %v614_v22 = vsub.f32 %v598_v13, %v606_v15  ;;  %v1193_v23 = vpop.f32.mrb[2].mxu0  ;;  %v1198_v24 = vpop.f32.mrb[2].mxu1 }
  0xf4   : > { %v623_v26 = vmax.f32 %v615_v17, 0.0  ;;  %v611_v27 = vmul.f32 2.0, %v1193_v23  ;;  %v613_v28 = vmul.f32 2.0, %v1198_v24  ;;  %v524_v29 = vpop.f32.mrb[3].mxu1  ;;  %v443_v30 = vpop.f32.mrb[3].mxu0  ;;  %v625_v34 = vmax.f32 %v617_v18, 0.0 }
  0xf5   : > { %v622_v31 = vmax.f32 %v614_v22, 0.0  ;;  %v612_v32 = vmul.f32 2.0, %v524_v29  ;;  %v610_v33 = vmul.f32 2.0, %v443_v30  ;;  %v1490_v37 = vmax.f32 %v616_v20, 0.0 }
  0xf6   : > { %v619_v35 = vsub.f32 %v603_v16, %v611_v27  ;;  %v621_v36 = vsub.f32 %v605_v19, %v613_v28  ;;  %1264 = vrsqrt.f32 %v623_v26  ;;  %vm639_vm2 = vcmp.eq.f32.partialorder %v623_v26, inf }
  0xf7   : > { %v620_v38 = vsub.f32 %v604_v25, %v612_v32  ;;  %v618_v39 = vsub.f32 %v602_v21, %v610_v33  ;;  %1266 = vrsqrt.f32 %v622_v31  ;;  %vm641_vm3 = vcmp.eq.f32.partialorder %v623_v26, 0.0 }
  0xf8   : > { %v1492_v40 = vmax.f32 %v619_v35, 0.0  ;;  %v1496_v42 = vmax.f32 %v621_v36, 0.0  ;;  %1268 = vrsqrt.f32 %v625_v34  ;;  %v642_v45 = vand.u32 2147483648, %v623_v26  ;;  %v742_v36 = vld [vmem:[%s1647_s2] sm:$0xff] }
  0xf9   : > { %v1494_v41 = vmax.f32 %v618_v39, 0.0  ;;  %v1498_v43 = vmax.f32 %v620_v38, 0.0  ;;  %1270 = vrsqrt.f32 %v1490_v37  ;;  %vm632_vm4 = vcmp.eq.f32.partialorder %v622_v31, inf }
  0xfa   : > { %1272 = vrsqrt.f32 %v1492_v40  ;;  %vm634_vm5 = vcmp.eq.f32.partialorder %v622_v31, 0.0  ;;  %v635_v47 = vand.u32 2147483648, %v622_v31  ;;  %vm653_vm6 = vcmp.eq.f32.partialorder %v625_v34, inf }
  0xfb   : > { %1274 = vrsqrt.f32 %v1494_v41  ;;  %vm655_vm7 = vcmp.eq.f32.partialorder %v625_v34, 0.0  ;;  %v656_v49 = vand.u32 2147483648, %v625_v34  ;;  %vm646_vm8 = vcmp.eq.f32.partialorder %v1490_v37, inf }
  0xfc   : > { %1276 = vrsqrt.f32 %v1496_v42  ;;  %vm648_vm9 = vcmp.eq.f32.partialorder %v1490_v37, 0.0  ;;  %v649_v50 = vand.u32 2147483648, %v1490_v37  ;;  %vm667_vm10 = vcmp.eq.f32.partialorder %v1492_v40, inf }
  0xfd   : > { %1278 = vrsqrt.f32 %v1498_v43  ;;  %vm669_vm11 = vcmp.eq.f32.partialorder %v1492_v40, 0.0  ;;  %v670_v55 = vand.u32 2147483648, %v1492_v40  ;;  %vm660_vm12 = vcmp.eq.f32.partialorder %v1494_v41, inf }
  0xfe   : > { %vm662_vm13 = vcmp.eq.f32.partialorder %v1494_v41, 0.0  ;;  %v663_v60 = vand.u32 2147483648, %v1494_v41  ;;  %vm681_vm14 = vcmp.eq.f32.partialorder %v1496_v42, inf  ;;  %vm683_vm15 = vcmp.eq.f32.partialorder %v1496_v42, 0.0 }
  0xff   : > { %v684_v9 = vand.u32 2147483648, %v1496_v42  ;;  %vm674_vm0 = vcmp.eq.f32.partialorder %v1498_v43, inf  ;;  %v677_v24 = vand.u32 2147483648, %v1498_v43 }
 0x100   : > { %v1265_v44 = vpop.eup %1264 }
 0x101   : > { %v638_v46 = vmul.f32 %v1265_v44, %v623_v26  ;;  %v1267_v48 = vpop.eup %1266 }
 0x102   : > { %v631_v52 = vmul.f32 %v1267_v48, %v622_v31  ;;  %v1269_v53 = vpop.eup %1268 }
 0x103   : > { %v640_v51 = vsel %vm639_vm2, %v623_v26, %v638_v46  ;;  %v1271_v56 = vpop.eup %1270  ;;  %v652_v59 = vmul.f32 %v1269_v53, %v625_v34  ;;  %vm676_vm2 = vcmp.eq.f32.partialorder %v1498_v43, 0.0 }
 0x104   : > { %v643_v54 = vsel %vm641_vm3, %v642_v45, %v640_v51  ;;  %v633_v58 = vsel %vm632_vm4, %v622_v31, %v631_v52  ;;  %v1273_v61 = vpop.eup %1272  ;;  %v645_v63 = vmul.f32 %v1271_v56, %v1490_v37 }
 0x105   : > { %v1515_v57 = vmul.f32 2.0, %v643_v54  ;;  %v636_v62 = vsel %vm634_vm5, %v635_v47, %v633_v58  ;;  %v1275_v0 = vpop.eup %1274  ;;  %v654_v3 = vsel %vm653_vm6, %v625_v34, %v652_v59  ;;  %v666_v4 = vmul.f32 %v1273_v61, %v1492_v40 }
 0x106   : > { %v686_v2 = vmul.f32 2.0, %v636_v62  ;;  %v1277_v5 = vpop.eup %1276  ;;  %v657_v6 = vsel %vm655_vm7, %v656_v49, %v654_v3  ;;  %v647_v7 = vsel %vm646_vm8, %v1490_v37, %v645_v63  ;;  %v659_v8 = vmul.f32 %v1275_v0, %v1494_v41  ;;  %v743_v37 = vld [vmem:[%s1647_s2 + $0x8] sm:$0xff] }
 0x107   : > { %v697_v1 = vsel %vm569_vm1, %v1515_v57, -inf  ;;  %v1279_v10 = vpop.eup %1278  ;;  %v689_v12 = vmul.f32 2.0, %v657_v6  ;;  %v650_v13 = vsel %vm648_vm9, %v649_v50, %v647_v7  ;;  %v668_v14 = vsel %vm667_vm10, %v1492_v40, %v666_v4 }
 0x108   : > { %698 = vmax.xlane.f32.xlu1 %v697_v1  ;;  %v694_v11 = vsel %vm569_vm1, %v686_v2, -inf  ;;  %v688_v15 = vmul.f32 2.0, %v650_v13  ;;  %v671_v16 = vsel %vm669_vm11, %v670_v55, %v668_v14  ;;  %v661_v17 = vsel %vm660_vm12, %v1494_v41, %v659_v8 }
 0x109   : > { %695 = vmax.xlane.f32.xlu0 %v694_v11  ;;  %v680_v18 = vmul.f32 %v1277_v5, %v1496_v42  ;;  %v703_v19 = vsel %vm569_vm1, %v689_v12, -inf  ;;  %v691_v20 = vmul.f32 2.0, %v671_v16  ;;  %v664_v21 = vsel %vm662_vm13, %v663_v60, %v661_v17 }
 0x10a   : > { %v673_v22 = vmul.f32 %v1279_v10, %v1498_v43  ;;  %v700_v25 = vsel %vm569_vm1, %v688_v15, -inf  ;;  %v690_v26 = vmul.f32 2.0, %v664_v21  ;;  %v1215_v38 = vpack.c.bf16 %v743_v37, %v742_v36 }
 0x10b   : > { %v682_v23 = vsel %vm681_vm14, %v1496_v42, %v680_v18  ;;  %v709_v30 = vsel %vm569_vm1, %v691_v20, -inf }
 0x10c   : > { %704 = vmax.xlane.f32.xlu1 %v703_v19  ;;  %v685_v27 = vsel %vm683_vm15, %v684_v9, %v682_v23  ;;  %v675_v28 = vsel %vm674_vm0, %v1498_v43, %v673_v22  ;;  %v706_v32 = vsel %vm569_vm1, %v690_v26, -inf  ;;  %1216 = vmatprep.subr.bf16.mxu0 %v1215_v38 }
 0x10d   : > { %701 = vmax.xlane.f32.xlu0 %v700_v25  ;;  %v678_v29 = vsel %vm676_vm2, %v677_v24, %v675_v28  ;;  %v693_v31 = vmul.f32 2.0, %v685_v27  ;;  %1219 = vmatprep.subr.bf16.mxu1 %v1215_v38 }
 0x10e   : > { %v692_v33 = vmul.f32 2.0, %v678_v29  ;;  %1218 = vmatpush3.bf16.msra.mxu0 %v1215_v38  ;;  %1220 = vmatpush3.bf16.msra.mxu1 %v1215_v38 }
 0x10f   : > { %v715_v34 = vsel %vm569_vm1, %v693_v31, -inf }
 0x110   : > { %710 = vmax.xlane.f32.xlu1 %v709_v30  ;;  %v712_v35 = vsel %vm569_vm1, %v692_v33, -inf }
 0x111   : > { %707 = vmax.xlane.f32.xlu0 %v706_v32 }
 0x114   : > { %716 = vmax.xlane.f32.xlu1 %v715_v34 }
 0x115   : > { %713 = vmax.xlane.f32.xlu0 %v712_v35 }
 0x195   : > { %v699_v39 = vpop.xlane.xlu1 %698 }
 0x196   : > { %v719_v40 = vsub.f32 %v1515_v57, %v699_v39  ;;  %v696_v41 = vpop.xlane.xlu0 %695  ;;  %v874_v7 = vsub.f32 0.0, %v699_v39 }
 0x197   : > { %v718_v42 = vsub.f32 %v686_v2, %v696_v41  ;;  %v873_v8 = vsub.f32 0.0, %v696_v41 }
 0x198   : > { %v728_v43 = vmul.f32 1.442695, %v719_v40  ;;  %v883_v9 = vmul.f32 1.442695, %v874_v7 }
 0x199   : > { %v705_v44 = vpop.xlane.xlu1 %704  ;;  %v726_v45 = vmul.f32 1.442695, %v718_v42  ;;  %v881_v11 = vmul.f32 1.442695, %v873_v8 }
 0x19a   : > { %v721_v46 = vsub.f32 %v689_v12, %v705_v44  ;;  %v702_v47 = vpop.xlane.xlu0 %701  ;;  %v876_v10 = vsub.f32 0.0, %v705_v44 }
 0x19b   : > { %1280 = vpow2.f32 %v726_v45  ;;  %v720_v48 = vsub.f32 %v688_v15, %v702_v47  ;;  %v875_v12 = vsub.f32 0.0, %v702_v47 }
 0x19c   : > { %1282 = vpow2.f32 %v728_v43  ;;  %v732_v49 = vmul.f32 1.442695, %v721_v46  ;;  %v887_v13 = vmul.f32 1.442695, %v876_v10 }
 0x19d   : > { %v711_v50 = vpop.xlane.xlu1 %710  ;;  %v730_v51 = vmul.f32 1.442695, %v720_v48  ;;  %v885_v15 = vmul.f32 1.442695, %v875_v12 }
 0x19e   : > { %v723_v52 = vsub.f32 %v691_v20, %v711_v50  ;;  %v708_v53 = vpop.xlane.xlu0 %707  ;;  %v878_v14 = vsub.f32 0.0, %v711_v50 }
 0x19f   : > { %1284 = vpow2.f32 %v730_v51  ;;  %v722_v54 = vsub.f32 %v690_v26, %v708_v53  ;;  %v877_v16 = vsub.f32 0.0, %v708_v53 }
 0x1a0   : > { %1286 = vpow2.f32 %v732_v49  ;;  %v736_v55 = vmul.f32 1.442695, %v723_v52  ;;  %v891_v17 = vmul.f32 1.442695, %v878_v14 }
 0x1a1   : > { %v717_v56 = vpop.xlane.xlu1 %716  ;;  %v734_v57 = vmul.f32 1.442695, %v722_v54  ;;  %v889_v18 = vmul.f32 1.442695, %v877_v16 }
 0x1a2   : > { %v725_v58 = vsub.f32 %v693_v31, %v717_v56  ;;  %v714_v59 = vpop.xlane.xlu0 %713  ;;  %v880_v20 = vsub.f32 0.0, %v717_v56 }
 0x1a3   : > { %1288 = vpow2.f32 %v734_v57  ;;  %v724_v60 = vsub.f32 %v692_v33, %v714_v59  ;;  %v879_v19 = vsub.f32 0.0, %v714_v59 }
 0x1a4   : > { %1290 = vpow2.f32 %v736_v55  ;;  %v740_v61 = vmul.f32 1.442695, %v725_v58  ;;  %v895_v24 = vmul.f32 1.442695, %v880_v20  ;;  %v961_v55 = vlaneseq }
 0x1a5   : > { %v1281_v62 = vpop.eup %1280  ;;  %v738_v63 = vmul.f32 1.442695, %v724_v60  ;;  %v893_v21 = vmul.f32 1.442695, %v879_v19 }
 0x1a6   : > { %v1283_v0 = vpop.eup %1282  ;;  %1203 = vmatprep.mubr.msk.f32.mxu0 %vm569_vm1, %v1281_v62  ;;  %v962_v58 = vshrl.u32 %v961_v55, 7 }
 0x1a7   : > { %1292 = vpow2.f32 %v738_v63  ;;  %1204 = vmatmul.mubr.msk.f32.vlgmr.msra.gmra.mrb[4].mxu0 %vm569_vm1, %v1283_v0 }
 0x1a8   : > { %1294 = vpow2.f32 %v740_v61  ;;  %v963_v60 = vadd.s32 8, %v962_v58 }
 0x1a9   : > { %v1285_v1 = vpop.eup %1284  ;;  %1296 = vpow2.f32 %v883_v9 }
 0x1aa   : > { %v1287_v2 = vpop.eup %1286  ;;  %1206 = vmatprep.mubr.msk.f32.mxu0 %vm569_vm1, %v1285_v1  ;;  %1298 = vpow2.f32 %v881_v11  ;;  %v965_v63 = vcvt.s32.f32 %v963_v60  ;;  %v964_v1 = vcvt.s32.f32 %v962_v58 }
 0x1ab   : > { %1207 = vmatmul.mubr.msk.f32.gmra.mrb[6].mxu0 %vm569_vm1, %v1287_v2  ;;  %1300 = vpow2.f32 %v887_v13 }
 0x1ac   : > { %1302 = vpow2.f32 %v885_v15 }
 0x1ad   : > { %v1289_v3 = vpop.eup %1288  ;;  %1304 = vpow2.f32 %v891_v17 }
 0x1ae   : > { %v1291_v4 = vpop.eup %1290  ;;  %1209 = vmatprep.mubr.msk.f32.mxu1 %vm569_vm1, %v1289_v3  ;;  %1306 = vpow2.f32 %v889_v18 }
 0x1af   : > { %1210 = vmatmul.mubr.msk.f32.vlgmr.msra.gmra.mrb[4].mxu1 %vm569_vm1, %v1291_v4  ;;  %1308 = vpow2.f32 %v893_v21 }
 0x1b0   : > { %1310 = vpow2.f32 %v895_v24 }
 0x1b1   : > { %v1293_v5 = vpop.eup %1292 }
 0x1b2   : > { %v1295_v6 = vpop.eup %1294  ;;  %1212 = vmatprep.mubr.msk.f32.mxu1 %vm569_vm1, %v1293_v5 }
 0x1b3   : > { %1213 = vmatmul.mubr.msk.f32.gmra.mrb[6].mxu1 %vm569_vm1, %v1295_v6  ;;  %v1297_v22 = vpop.eup %1296  ;;  %vm1014_vm1 = vcmask 7168  }
 0x1b4   : > { %v1299_v23 = vpop.eup %1298  ;;  %v898_v25 = vmul.f32 1e-07, %v1297_v22 }
 0x1b5   : > { %v1301_v26 = vpop.eup %1300  ;;  %v897_v28 = vmul.f32 1e-07, %v1299_v23 }
 0x1b6   : > { %v1303_v29 = vpop.eup %1302  ;;  %v900_v33 = vmul.f32 1e-07, %v1301_v26 }
 0x1b7   : > { %v1305_v34 = vpop.eup %1304  ;;  %v899_v36 = vmul.f32 1e-07, %v1303_v29 }
 0x1b8   : > { %v1307_v37 = vpop.eup %1306  ;;  %v902_v41 = vmul.f32 1e-07, %v1305_v34 }
 0x1b9   : > { %v901_v43 = vmul.f32 1e-07, %v1307_v37  ;;  %v1309_v44 = vpop.eup %1308 }
 0x1ba   : > { %v903_v49 = vmul.f32 1e-07, %v1309_v44  ;;  %v1311_v50 = vpop.eup %1310 }
 0x1bb   : > { %v904_v53 = vmul.f32 1e-07, %v1311_v50 }
 0x27a   : > { %v1205_v27 = vpop.f32.mrb[4].mxu0 }
 0x27b   : > { %v906_v30 = vadd.f32 %v1205_v27, %v898_v25  ;;  %v834_v31 = vpop.f32.mrb[5].mxu0 }
 0x27c   : > { %v905_v32 = vadd.f32 %v897_v28, %v834_v31 }
 0x27d   : > { %923 = vrot.lane.b32.xlu1 %v906_v30, %s1392_s10 }
 0x27e   : > { %v1578_v35 = vpop.f32.mrb[6].mxu0  ;;  %921 = vrot.lane.b32.xlu0 %v905_v32, %s1392_s10 }
 0x27f   : > { %v908_v38 = vadd.f32 %v1578_v35, %v900_v33  ;;  %v844_v39 = vpop.f32.mrb[7].mxu0 }
 0x280   : > { %v907_v40 = vadd.f32 %v899_v36, %v844_v39 }
 0x282   : > { %925 = vrot.lane.b32.xlu1 %v907_v40, %s1392_s10  ;;  %v1581_v42 = vpop.f32.mrb[4].mxu1 }
 0x283   : > { %v910_v45 = vadd.f32 %v1581_v42, %v902_v41  ;;  %v854_v46 = vpop.f32.mrb[5].mxu1 }
 0x284   : > { %v909_v47 = vadd.f32 %v901_v43, %v854_v46 }
 0x286   : > { %927 = vrot.lane.b32.xlu1 %v908_v38, %s1392_s10  ;;  %929 = vrot.lane.b32.xlu0 %v909_v47, %s1392_s10  ;;  %v1584_v48 = vpop.f32.mrb[6].mxu1 }
 0x287   : > { %v864_v51 = vpop.f32.mrb[7].mxu1  ;;  %v912_v54 = vadd.f32 %v1584_v48, %v904_v53 }
 0x288   : > { %v911_v52 = vadd.f32 %v903_v49, %v864_v51 }
 0x28a   : > { %931 = vrot.lane.b32.xlu1 %v910_v45, %s1392_s10  ;;  %933 = vrot.lane.b32.xlu0 %v911_v52, %s1392_s10 }
 0x28e   : > { %935 = vrot.lane.b32.xlu1 %v912_v54, %s1392_s10 }
 0x2ef   : > { %v924_v56 = vpop.permute.xlu1 %923 }
 0x2f0   : > { %1312 = vrcp.f32 %v924_v56  ;;  %v922_v57 = vpop.permute.xlu0 %921 }
 0x2f1   : > { %1314 = vrcp.f32 %v922_v57 }
 0x2f4   : > { %v926_v59 = vpop.permute.xlu1 %925 }
 0x2f5   : > { %1316 = vrcp.f32 %v926_v59 }
 0x2f8   : > { %v928_v61 = vpop.permute.xlu1 %927  ;;  %v930_v62 = vpop.permute.xlu0 %929 }
 0x2f9   : > { %1318 = vrcp.f32 %v928_v61 }
 0x2fa   : > { %v1313_v0 = vpop.eup %1312  ;;  %1320 = vrcp.f32 %v930_v62 }
 0x2fb   : > { %v1315_v2 = vpop.eup %1314  ;;  %v948_v3 = vmul.f32 %v1313_v0, %v1205_v27 }
 0x2fc   : > { %v932_v4 = vpop.permute.xlu1 %931  ;;  %v934_v5 = vpop.permute.xlu0 %933  ;;  %v946_v6 = vmul.f32 %v1315_v2, %v834_v31 }
 0x2fd   : > { %1322 = vrcp.f32 %v932_v4  ;;  %v967_v7 = vsub.f32 %v948_v3, %v965_v63 }
 0x2fe   : > { %1324 = vrcp.f32 %v934_v5  ;;  %v966_v8 = vsub.f32 %v946_v6, %v964_v1 }
 0x2ff   : > { %v1317_v9 = vpop.eup %1316  ;;  %v975_v10 = vmul.f32 %v967_v7, %v967_v7 }
 0x300   : > { %v936_v11 = vpop.permute.xlu1 %935  ;;  %v974_v12 = vmul.f32 %v966_v8, %v966_v8  ;;  %v950_v13 = vmul.f32 %v1317_v9, %v844_v39 }
 0x301   : > { %1326 = vrcp.f32 %v936_v11  ;;  %992 = vrot.lane.b32.xlu1 %v975_v10, %s1393_s11 }
 0x302   : > { %990 = vrot.lane.b32.xlu0 %v974_v12, %s1393_s11  ;;  %v968_v14 = vsub.f32 %v950_v13, %v964_v1 }
 0x303   : > { %v1319_v15 = vpop.eup %1318 }
 0x304   : > { %v1321_v16 = vpop.eup %1320  ;;  %v976_v17 = vmul.f32 %v968_v14, %v968_v14  ;;  %v952_v18 = vmul.f32 %v1319_v15, %v1578_v35 }
 0x305   : > { %v954_v19 = vmul.f32 %v1321_v16, %v854_v46 }
 0x306   : > { %994 = vrot.lane.b32.xlu0 %v976_v17, %s1393_s11  ;;  %v969_v20 = vsub.f32 %v952_v18, %v965_v63 }
 0x307   : > { %v1323_v21 = vpop.eup %1322  ;;  %v970_v22 = vsub.f32 %v954_v19, %v964_v1 }
 0x308   : > { %v1325_v23 = vpop.eup %1324  ;;  %v977_v24 = vmul.f32 %v969_v20, %v969_v20  ;;  %v956_v25 = vmul.f32 %v1323_v21, %v1581_v42 }
 0x309   : > { %v978_v26 = vmul.f32 %v970_v22, %v970_v22  ;;  %v958_v27 = vmul.f32 %v1325_v23, %v864_v51 }
 0x30a   : > { %996 = vrot.lane.b32.xlu1 %v977_v24, %s1393_s11  ;;  %v971_v28 = vsub.f32 %v956_v25, %v965_v63 }
 0x30b   : > { %v1327_v29 = vpop.eup %1326  ;;  %998 = vrot.lane.b32.xlu0 %v978_v26, %s1393_s11  ;;  %v972_v30 = vsub.f32 %v958_v27, %v964_v1 }
 0x30c   : > { %v979_v31 = vmul.f32 %v971_v28, %v971_v28  ;;  %v960_v32 = vmul.f32 %v1327_v29, %v1584_v48 }
 0x30d   : > { %v980_v33 = vmul.f32 %v972_v30, %v972_v30 }
 0x30e   : > { %1000 = vrot.lane.b32.xlu1 %v979_v31, %s1393_s11  ;;  %v973_v34 = vsub.f32 %v960_v32, %v965_v63 }
 0x30f   : > { %1002 = vrot.lane.b32.xlu0 %v980_v33, %s1393_s11 }
 0x310   : > { %v981_v35 = vmul.f32 %v973_v34, %v973_v34 }
 0x312   : > { %1004 = vrot.lane.b32.xlu1 %v981_v35, %s1393_s11 }
 0x373   : > { %v993_v36 = vpop.permute.xlu1 %992 }
 0x374   : > { %v991_v37 = vpop.permute.xlu0 %990  ;;  %v1016_v38 = vsel %vm1014_vm1, %v993_v36, 0.0 }
 0x375   : > { %v1015_v39 = vsel %vm1014_vm1, %v991_v37, 0.0 }
 0x376   : > { %v1017_v42 = vadd.f32 %v1016_v38, %v1015_v39 }
 0x378   : > { %v995_v40 = vpop.permute.xlu0 %994 }
 0x379   : > { %v1018_v41 = vsel %vm1014_vm1, %v995_v40, 0.0 }
 0x37a   : > { %v1019_v43 = vadd.f32 %v1018_v41, %v1017_v42 }
 0x37c   : > { %v997_v44 = vpop.permute.xlu1 %996 }
 0x37d   : > { %v1020_v45 = vsel %vm1014_vm1, %v997_v44, 0.0  ;;  %v999_v46 = vpop.permute.xlu0 %998 }
 0x37e   : > { %v1021_v47 = vadd.f32 %v1020_v45, %v1019_v43  ;;  %v1022_v48 = vsel %vm1014_vm1, %v999_v46, 0.0 }
 0x380   : > { %v1023_v49 = vadd.f32 %v1022_v48, %v1021_v47  ;;  %v1001_v50 = vpop.permute.xlu1 %1000 }
 0x381   : > { %v1024_v51 = vsel %vm1014_vm1, %v1001_v50, 0.0  ;;  %v1003_v52 = vpop.permute.xlu0 %1002 }
 0x382   : > { %v1025_v53 = vadd.f32 %v1024_v51, %v1023_v49  ;;  %v1026_v54 = vsel %vm1014_vm1, %v1003_v52, 0.0 }
 0x384   : > { %v1027_v55 = vadd.f32 %v1026_v54, %v1025_v53  ;;  %v1005_v56 = vpop.permute.xlu1 %1004 }
 0x385   : > { %v1028_v57 = vsel %vm1014_vm1, %v1005_v56, 0.0 }
 0x386   : > { %v1029_v58 = vadd.f32 %v1028_v57, %v1027_v55 }
 0x388   : > { %1030 = vadd.xlane.f32.xlu0 %v1029_v58 }
 0x415   : > { %v1031_v59 = vpop.xlane.xlu0 %1030 }
 0x416   : > { %v1032_v60 = vrot.slane %v1031_v59, 4 }
 0x418   : > { %v1033_v61 = vadd.f32 %v1032_v60, %v1031_v59 }
 0x41a   : > { %v1034_v62 = vrot.slane %v1033_v61, 2 }
 0x41c   : > { %v1035_v63 = vadd.f32 %v1034_v62, %v1033_v61 }
 0x41e   : > { %v1036_v0 = vrot.slane %v1035_v63, 1 }
 0x420   : > { %v1037_v1 = vadd.f32 %v1036_v0, %v1035_v63 }
 0x422   : > { %1221 = vpush %v1037_v1 }
 0x453   : > { %s1222_s26 = spop %1221 }
 0x454   : > { %v1039_v2 = vstv %s1222_s26 }
 0x455   : > { %1040 = vst [vmem:[%s182_s20] sm:$0xff] %v1039_v2 }
 0x456   : > { %1341 = shalt.err (!%p1338_p3)
}
 0x457   : > { %s1342_s7 = scalar_lea.hbm %s1605_s29, 128  ;;  %s1346_s10 = scalar_lea.hbm %s1648_s3, 256 }
 0x458   : > { %p1343_p4 = scmp.ne.s32.totalorder %s1605_s29, %s1342_s7  ;;  %p1347_p9 = scmp.lt.u32.totalorder %s1605_s29, %s1648_s3 }
 0x459   : > { %p1348_p10 = scmp.lt.u32.totalorder %s1346_s10, %s1342_s7  ;;  %p1350_p12 = scmp.lt.u32.totalorder %s1342_s7, %s1605_s29 }
 0x45a   : > { %p1344_p7 = pnand %p1343_p4, %p1453_p5 }
 0x45b   : > { %p1349_p11 = por %p1348_p10, %p1347_p9 }
 0x45c   : > { %p1345_p8 = pneg %p1344_p7 }
 0x45d   : > { %p1351_p13 = por %p1350_p12, %p1349_p11 }
 0x45f   : > { %p1352_p0 = pnand %p1351_p13, %p1345_p8 }
 0x461   : > { %1355 = shalt.err (!%p1352_p0)
}
 0x462   : > { %1223 = dma.vmem_to_hbm [thread:$0]  (%p1453_p5), %s1600_s24, 128, %s1605_s29, %s1042_s30  }
 0x463 PF: > { %p1229_p1 = scmp.ge.s32.totalorder %s1390_s15, 2  ;;  %s1067_s19 = sand.u32 1, %s1378_s12  }
 0x464   : > { %s1068_s20 = scalar_lea.sflag [#allocation3], %s1067_s19 }
 0x465   : > { %p1226_p2 = pnand %p1229_p1, %p1457_p6 }
 0x467   : > { %1373 = dma.done.wait (!%p1226_p2), %s1068_s20, 128  }
 0x468   : > { %1375 = vsyncadd (!%p1226_p2), %s1068_s20, 4294967168  ;;  %p13_p3 = scmp.ge.s32.totalorder %s1440_s18, 4   ;;  %s1651_s12 = smov %s1382_s13 }
 0x469   : > { %s1652_s13 = smov %s1386_s14  ;;  %s1653_s14 = smov %s1451_s21 }
 0x46a   : > { %s1654_s15 = smov %s1440_s18  ;;  %15 = sbr.rel (!%p13_p3) target bundleno = 3 (0x3), region = 70 }
 0x471   :  { %1073 = vsyncpa [#allocation3], 1 }
 0x472   :  { %1075 = vsyncpa [#allocation3 + $0x1], 1 }

</bundles_post_ra>
